<compile_context>
chip_gen: v5e
topology: v5e:2x2
jax: 0.10.0
libtpu: 0.0.40
codegen_flags: <defaults>
</compile_context>

<pallas_src>
import functools

import jax
import jax.numpy as jnp
from jax.experimental import pallas as pl
from jax.experimental.pallas import tpu as pltpu

LANE = 128


def _round_up(x, m):
    return (x + m - 1) // m * m


def _pad2(a, rows, cols):
    return jnp.pad(a, ((0, rows - a.shape[0]), (0, cols - a.shape[1])))


def _pad1(a, n):
    return jnp.pad(a, (0, n - a.shape[0]))


# ----------------------------- Pallas kernel --------------------------------

def _make_fused_kernel(compute_dtype):
    """Fused 3x (GCN + ReLU) + FC head; everything stays resident in VMEM."""

    def kernel(x_ref, adj_ref, w_ref, b_ref, wfc_ref, bfc_ref, o_ref):
        adj = adj_ref[...]                      # (N_p, N_p)
        h = x_ref[...]                          # (N_p, FP)
        b_all = b_ref[...]                      # (3, FP) f32

        for layer in range(3):                  # static unroll
            w = w_ref[layer]                    # (FP, FP)
            b = b_all[layer:layer + 1, :]       # (1, FP)
            # torch order: support = h @ W ; out = adj @ support
            sup = jnp.dot(h, w, preferred_element_type=jnp.float32)
            out = jnp.dot(adj, sup.astype(compute_dtype),
                          preferred_element_type=jnp.float32)
            h = jnp.maximum(out + b, 0.0).astype(compute_dtype)   # bias + ReLU

        # FC head: weight replicated across 128 lanes -> lane-dense store.
        # Every lane of a row holds the same scalar; lane 0 is read outside.
        y = jnp.dot(h, wfc_ref[...], preferred_element_type=jnp.float32)
        o_ref[...] = y + bfc_ref[0, 0]          # SMEM scalar bias

    return kernel


# -------------------------- one-time param packing ---------------------------

def prepare_params(params, compute_dtype=jnp.float32):
    """Pad / cast / pack all parameters once, outside the hot path."""
    f_in, f_h1 = params["w1"].shape
    f_h2 = params["w2"].shape[1]
    f_out = params["w3"].shape[1]

    # One common padded feature width so the 3 GCN weights pack into one buffer.
    fp = max(_round_up(d, LANE) for d in (f_in, f_h1, f_h2, f_out))

    w_packed = jnp.stack([
        _pad2(params["w1"], fp, fp),
        _pad2(params["w2"], fp, fp),
        _pad2(params["w3"], fp, fp),
    ]).astype(compute_dtype)                                        # (3, FP, FP)

    b_packed = jnp.stack([
        _pad1(params["b1"], fp),
        _pad1(params["b2"], fp),
        _pad1(params["b3"], fp),
    ]).astype(jnp.float32)                                          # (3, FP)

    # FC weight (f_out, 1): zero-pad rows, replicate across 128 lanes.
    w_fc = jnp.tile(_pad2(params["w_fc"], fp, 1),
                    (1, LANE)).astype(compute_dtype)                # (FP, 128)
    b_fc = params["b_fc"].reshape(1, 1).astype(jnp.float32)         # SMEM scalar

    return dict(w_packed=w_packed, b_packed=b_packed, w_fc=w_fc, b_fc=b_fc)


# ------------------------------ JAX wrapper ----------------------------------

@functools.partial(jax.jit, static_argnames=("compute_dtype",))
def gnn_forward(prep, x, adj, compute_dtype=jnp.float32):
    n = x.shape[0]
    fp = prep["w_packed"].shape[1]

    # Pad N only to the sublane multiple (8 for f32, 16 for bf16), not 128.
    sublane = 8 * 4 // jnp.dtype(compute_dtype).itemsize
    n_p = _round_up(n, sublane)

    # Zero padding keeps real outputs unchanged (zero adj columns / zero
    # weight rows contribute nothing; padded rows are sliced away below).
    x_p = _pad2(x, n_p, fp).astype(compute_dtype)
    adj_p = _pad2(adj, n_p, n_p).astype(compute_dtype)

    kernel = _make_fused_kernel(compute_dtype)

    itb = jnp.dtype(compute_dtype).itemsize
    flops = 3 * (2 * n_p * fp * fp + 2 * n_p * n_p * fp) + 2 * n_p * fp * LANE
    bytes_accessed = (x_p.size * itb + adj_p.size * itb
                      + prep["w_packed"].size * itb
                      + prep["b_packed"].size * 4
                      + prep["w_fc"].size * itb + 4
                      + n_p * LANE * 4)
    cost = pl.CostEstimate(flops=int(flops), transcendentals=0,
                           bytes_accessed=int(bytes_accessed))

    vmem = pl.BlockSpec(memory_space=pltpu.MemorySpace.VMEM)
    smem = pl.BlockSpec(memory_space=pltpu.MemorySpace.SMEM)

    out = pl.pallas_call(
        kernel,
        out_shape=jax.ShapeDtypeStruct((n_p, LANE), jnp.float32),
        in_specs=[vmem, vmem,        # x, adj
                  vmem, vmem,        # packed GCN weights / biases
                  vmem, smem],       # fc weight, fc bias scalar
        out_specs=vmem,
        cost_estimate=cost,
    )(x_p, adj_p, prep["w_packed"], prep["b_packed"], prep["w_fc"], prep["b_fc"])

    # Lane 0 of each row holds fc(x); drop node padding; squeeze -> (N,).
    return out[:n, 0]


# --------------------------- parameter construction -------------------------

def init_params(key, in_features, h1, h2, out_features):
    ks = jax.random.split(key, 8)

    def gc_init(kw, kb, fin, fout):
        stdv = 1.0 / (fout ** 0.5)
        w = jax.random.uniform(kw, (fin, fout), jnp.float32, -stdv, stdv)
        b = jax.random.uniform(kb, (fout,), jnp.float32, -stdv, stdv)
        return w, b

    w1, b1 = gc_init(ks[0], ks[1], in_features, h1)
    w2, b2 = gc_init(ks[2], ks[3], h1, h2)
    w3, b3 = gc_init(ks[4], ks[5], h2, out_features)

    # nn.Linear(out_features, 1): uniform bound 1/sqrt(fan_in)
    bound = 1.0 / (out_features ** 0.5)
    w_fc = jax.random.uniform(ks[6], (out_features, 1), jnp.float32, -bound, bound)
    b_fc = jax.random.uniform(ks[7], (1,), jnp.float32, -bound, bound)

    return dict(w1=w1, b1=b1, w2=w2, b2=b2, w3=w3, b3=b3, w_fc=w_fc, b_fc=b_fc)


def ref_forward(params, x, adj):
    h = jax.nn.relu(adj @ (x @ params["w1"]) + params["b1"])
    h = jax.nn.relu(adj @ (h @ params["w2"]) + params["b2"])
    h = jax.nn.relu(adj @ (h @ params["w3"]) + params["b3"])
    return jnp.squeeze(h @ params["w_fc"] + params["b_fc"])


# ---------------------------------- main -------------------------------------

if __name__ == "__main__":
    key = jax.random.PRNGKey(0)
    k_x, k_adj, k_p = jax.random.split(key, 3)

    N = 16              # number of graph nodes
    IN_F = 8            # in_features
    H1 = 32             # hidden_features1
    H2 = 32             # hidden_features2
    OUT_F = 16          # out_features

    x = jax.random.normal(k_x, (N, IN_F), jnp.float32)

    # symmetric row-normalized dense adjacency (stand-in for the sparse adj)
    a = jax.random.uniform(k_adj, (N, N), jnp.float32)
    a = (a + a.T) * 0.5 + jnp.eye(N, dtype=jnp.float32)
    adj = a / jnp.sum(a, axis=1, keepdims=True)

    params = init_params(k_p, IN_F, H1, H2, OUT_F)
    r = ref_forward(params, x, adj)

    # f32 path (matches PyTorch numerics) -- params packed once, outside jit.
    prep_f32 = prepare_params(params, jnp.float32)
    out = gnn_forward(prep_f32, x, adj, compute_dtype=jnp.float32)
    jax.block_until_ready(out)
    assert out.shape == (N,)
    assert jnp.allclose(out, r, atol=1e-4, rtol=1e-4), (
        f"f32 mismatch, max err {float(jnp.max(jnp.abs(out - r)))}")

    # bf16 MXU fast path: only on v6e / v7x (v5e has no bf16 VPU).
    kind = jax.devices()[0].device_kind.lower()
    if ("v6" in kind) or ("v7" in kind):
        prep_bf16 = prepare_params(params, jnp.bfloat16)
        out_bf16 = gnn_forward(prep_bf16, x, adj, compute_dtype=jnp.bfloat16)
        jax.block_until_ready(out_bf16)
        assert out_bf16.shape == (N,)
        # looser tolerance for bf16 activations / adjacency
        assert jnp.allclose(out_bf16, r, atol=1e-1, rtol=1e-1), (
            f"bf16 mismatch, max err {float(jnp.max(jnp.abs(out_bf16 - r)))}")

    print("KERNEL_OK")
</pallas_src>

<mosaic_0001>
module attributes {stable_mosaic.version = 11 : i64} {
  func.func @kernel(%arg0: memref<16x128xf32, #tpu.memory_space<vmem>>, %arg1: memref<16x16xf32, #tpu.memory_space<vmem>>, %arg2: memref<3x128x128xf32, #tpu.memory_space<vmem>>, %arg3: memref<3x128xf32, #tpu.memory_space<vmem>>, %arg4: memref<128x128xf32, #tpu.memory_space<vmem>>, %arg5: memref<1x1xf32, #tpu.memory_space<smem>>, %arg6: memref<16x128xf32, #tpu.memory_space<vmem>>) attributes {dimension_semantics = [], scalar_prefetch = 0 : i64, scratch_operands = 0 : i64, tpu.core_type = #tpu.core_type<tc>} {
    %c0 = arith.constant 0 : index
    %c0_0 = arith.constant 0 : index
    %0 = vector.load %arg1[%c0, %c0_0] : memref<16x16xf32, #tpu.memory_space<vmem>>, vector<16x16xf32>
    %c0_1 = arith.constant 0 : index
    %c0_2 = arith.constant 0 : index
    %1 = vector.load %arg0[%c0_1, %c0_2] : memref<16x128xf32, #tpu.memory_space<vmem>>, vector<16x128xf32>
    %c0_3 = arith.constant 0 : index
    %c0_4 = arith.constant 0 : index
    %2 = vector.load %arg3[%c0_3, %c0_4] : memref<3x128xf32, #tpu.memory_space<vmem>>, vector<3x128xf32>
    %c0_5 = arith.constant 0 : index
    %c0_6 = arith.constant 0 : index
    %c0_7 = arith.constant 0 : index
    %3 = vector.load %arg2[%c0_5, %c0_6, %c0_7] : memref<3x128x128xf32, #tpu.memory_space<vmem>>, vector<1x128x128xf32>
    %4 = vector.shape_cast %3 : vector<1x128x128xf32> to vector<128x128xf32>
    %5 = vector.extract_strided_slice %2 {offsets = [0, 0], sizes = [1, 128], strides = [1, 1]} : vector<3x128xf32> to vector<1x128xf32>
    %cst = arith.constant dense<0.000000e+00> : vector<16x128xf32>
    %6 = tpu.matmul %1, %4, %cst {dimension_numbers = #tpu.dot_dimension_numbers<[1], [0], [0], [1], [0, 0, 1, 1], [], []>} : vector<16x128xf32>, vector<128x128xf32>, vector<16x128xf32> -> vector<16x128xf32>
    %cst_8 = arith.constant dense<0.000000e+00> : vector<16x128xf32>
    %7 = tpu.matmul %0, %6, %cst_8 {dimension_numbers = #tpu.dot_dimension_numbers<[1], [0], [0], [1], [0, 0, 1, 1], [], []>} : vector<16x16xf32>, vector<16x128xf32>, vector<16x128xf32> -> vector<16x128xf32>
    %8 = vector.broadcast %5 : vector<1x128xf32> to vector<16x128xf32>
    %9 = arith.addf %7, %8 : vector<16x128xf32>
    %cst_9 = arith.constant 0.000000e+00 : f32
    %10 = vector.broadcast %cst_9 : f32 to vector<16x128xf32>
    %11 = arith.maximumf %9, %10 : vector<16x128xf32>
    %c1 = arith.constant 1 : index
    %c0_10 = arith.constant 0 : index
    %c0_11 = arith.constant 0 : index
    %12 = vector.load %arg2[%c1, %c0_10, %c0_11] : memref<3x128x128xf32, #tpu.memory_space<vmem>>, vector<1x128x128xf32>
    %13 = vector.shape_cast %12 : vector<1x128x128xf32> to vector<128x128xf32>
    %14 = vector.extract_strided_slice %2 {offsets = [1, 0], sizes = [1, 128], strides = [1, 1]} : vector<3x128xf32> to vector<1x128xf32>
    %cst_12 = arith.constant dense<0.000000e+00> : vector<16x128xf32>
    %15 = tpu.matmul %11, %13, %cst_12 {dimension_numbers = #tpu.dot_dimension_numbers<[1], [0], [0], [1], [0, 0, 1, 1], [], []>} : vector<16x128xf32>, vector<128x128xf32>, vector<16x128xf32> -> vector<16x128xf32>
    %cst_13 = arith.constant dense<0.000000e+00> : vector<16x128xf32>
    %16 = tpu.matmul %0, %15, %cst_13 {dimension_numbers = #tpu.dot_dimension_numbers<[1], [0], [0], [1], [0, 0, 1, 1], [], []>} : vector<16x16xf32>, vector<16x128xf32>, vector<16x128xf32> -> vector<16x128xf32>
    %17 = vector.broadcast %14 : vector<1x128xf32> to vector<16x128xf32>
    %18 = arith.addf %16, %17 : vector<16x128xf32>
    %cst_14 = arith.constant 0.000000e+00 : f32
    %19 = vector.broadcast %cst_14 : f32 to vector<16x128xf32>
    %20 = arith.maximumf %18, %19 : vector<16x128xf32>
    %c2 = arith.constant 2 : index
    %c0_15 = arith.constant 0 : index
    %c0_16 = arith.constant 0 : index
    %21 = vector.load %arg2[%c2, %c0_15, %c0_16] : memref<3x128x128xf32, #tpu.memory_space<vmem>>, vector<1x128x128xf32>
    %22 = vector.shape_cast %21 : vector<1x128x128xf32> to vector<128x128xf32>
    %23 = vector.extract_strided_slice %2 {offsets = [2, 0], sizes = [1, 128], strides = [1, 1]} : vector<3x128xf32> to vector<1x128xf32>
    %cst_17 = arith.constant dense<0.000000e+00> : vector<16x128xf32>
    %24 = tpu.matmul %20, %22, %cst_17 {dimension_numbers = #tpu.dot_dimension_numbers<[1], [0], [0], [1], [0, 0, 1, 1], [], []>} : vector<16x128xf32>, vector<128x128xf32>, vector<16x128xf32> -> vector<16x128xf32>
    %cst_18 = arith.constant dense<0.000000e+00> : vector<16x128xf32>
    %25 = tpu.matmul %0, %24, %cst_18 {dimension_numbers = #tpu.dot_dimension_numbers<[1], [0], [0], [1], [0, 0, 1, 1], [], []>} : vector<16x16xf32>, vector<16x128xf32>, vector<16x128xf32> -> vector<16x128xf32>
    %26 = vector.broadcast %23 : vector<1x128xf32> to vector<16x128xf32>
    %27 = arith.addf %25, %26 : vector<16x128xf32>
    %cst_19 = arith.constant 0.000000e+00 : f32
    %28 = vector.broadcast %cst_19 : f32 to vector<16x128xf32>
    %29 = arith.maximumf %27, %28 : vector<16x128xf32>
    %c0_20 = arith.constant 0 : index
    %c0_21 = arith.constant 0 : index
    %30 = vector.load %arg4[%c0_20, %c0_21] : memref<128x128xf32, #tpu.memory_space<vmem>>, vector<128x128xf32>
    %cst_22 = arith.constant dense<0.000000e+00> : vector<16x128xf32>
    %31 = tpu.matmul %29, %30, %cst_22 {dimension_numbers = #tpu.dot_dimension_numbers<[1], [0], [0], [1], [0, 0, 1, 1], [], []>} : vector<16x128xf32>, vector<128x128xf32>, vector<16x128xf32> -> vector<16x128xf32>
    %c0_23 = arith.constant 0 : index
    %c0_24 = arith.constant 0 : index
    %32 = memref.load %arg5[%c0_23, %c0_24] : memref<1x1xf32, #tpu.memory_space<smem>>
    %33 = vector.broadcast %32 : f32 to vector<16x128xf32>
    %34 = arith.addf %31, %33 : vector<16x128xf32>
    %c0_25 = arith.constant 0 : index
    %c0_26 = arith.constant 0 : index
    %35 = vector.load %arg6[%c0_25, %c0_26] : memref<16x128xf32, #tpu.memory_space<vmem>>, vector<16x128xf32>
    tpu.vector_store %arg6[%c0_25, %c0_26], %34 {strides = array<i32>} : memref<16x128xf32, #tpu.memory_space<vmem>>, vector<16x128xf32>,
    return
  }
}

</mosaic_0001>

<bundles_post_ra>
// kernel: gnn_forward.1
= control target key start
LH: loop header
LB: loop body
LE: loop exit
PB: predicated region body
PF: predicated region fallthrough
CT: control target
= control target key end

     0   :  { %12 = vsyncpa [#allocation4], 0  ;;  %s468_s0 = inlined_call_operand.vmem [shape: f32[16,128], index: 0, kind: input, shape index: {}]   ;;  %s469_s1 = inlined_call_operand.vmem [shape: f32[16,16], index: 1, kind: input, shape index: {}]   ;;  %s470_s2 = inlined_call_operand.hbm [shape: f32[3,128,128], index: 2, kind: input, shape index: {}]   ;;  %s471_s3 = inlined_call_operand.vmem [shape: f32[3,128], index: 3, kind: input, shape index: {}]   ;;  %s472_s4 = inlined_call_operand.hbm [shape: f32[128,128], index: 4, kind: input, shape index: {}]   ;;  %s473_s5 = inlined_call_operand.<no memory space> [shape: f32[1,1], index: 5, kind: input, shape index: {}]   ;;  %s474_s6 = inlined_call_operand.vmem [shape: f32[16,128], index: 6, kind: output, shape index: {}]  }
   0x1   :  { %s22_s23 = sshll.u32 %s470_s2, 4  ;;  %s23_s23 = int_to_ptr.hbm [resolvable:$true] %s22_s23 }
   0x2   :  { %13 = vsyncpa [#allocation6], 0  ;;  %s378_s24 = smov [#allocation3]   ;;  %s37_s28 = sshll.u32 %s472_s4, 4  ;;  %s38_s28 = int_to_ptr.hbm [resolvable:$true] %s37_s28 }
   0x3   :  { %s24_s25 = sshll.u32 %s378_s24, 4  ;;  %s379_s29 = smov 128   ;;  %s25_s25 = int_to_ptr.vmem [resolvable:$true] %s24_s25 }
   0x4   :  { %s380_s30 = smov 8   ;;  %s381_s7 = smov [#allocation5]  }
   0x5   :  { %30 = dma.hbm_to_vmem [thread:$0]  %s23_s23, 6144, %s25_s25, [#allocation4], %s379_s29, %s379_s29, %s380_s30  }
   0x6   :  { %s39_s8 = sshll.u32 %s381_s7, 4  ;;  %s40_s8 = int_to_ptr.vmem [resolvable:$true] %s39_s8 }
   0x7   :  { %45 = dma.hbm_to_vmem [thread:$0]  %s38_s28, 2048, %s40_s8, [#allocation6], %s379_s29, %s379_s29, %s380_s30  }
   0x8   :  { %374 = dma.done.wait [#allocation4], 6144  }
   0x9   :  { %375 = vsyncadd [#allocation4], 4294961152 }
   0xa   :  { %376 = dma.done.wait [#allocation6], 2048  }
   0xb   :  { %377 = vsyncadd [#allocation6], 4294965248  ;;  %v76_v0 = vld [vmem:[#allocation3 + $0x78] sm:$0xff]  ;;  %v75_v1 = vld [vmem:[#allocation3 + $0x70] sm:$0xff]  ;;  %vm101_vm0 = vcmask 130048  }
   0xc   :  { %77 = vmatpush.msra.mxu0 %v76_v0  ;;  %v74_v2 = vld [vmem:[#allocation3 + $0x68] sm:$0xff]  ;;  %v73_v3 = vld [vmem:[#allocation3 + $0x60] sm:$0xff]  ;;  %v72_v4 = vld [vmem:[#allocation3 + $0x58] sm:$0xff] }
   0xd   :  { %v71_v5 = vld [vmem:[#allocation3 + $0x50] sm:$0xff]  ;;  %v70_v6 = vld [vmem:[#allocation3 + $0x48] sm:$0xff]  ;;  %v69_v7 = vld [vmem:[#allocation3 + $0x40] sm:$0xff] }
   0xe   :  { %78 = vmatpush.msra.mxu0 %v75_v1  ;;  %v68_v8 = vld [vmem:[#allocation3 + $0x38] sm:$0xff]  ;;  %v67_v9 = vld [vmem:[#allocation3 + $0x30] sm:$0xff]  ;;  %v66_v10 = vld [vmem:[#allocation3 + $0x28] sm:$0xff] }
   0xf   :  { %v65_v11 = vld [vmem:[#allocation3 + $0x20] sm:$0xff]  ;;  %v64_v12 = vld [vmem:[#allocation3 + $0x18] sm:$0xff]  ;;  %v63_v13 = vld [vmem:[#allocation3 + $0x10] sm:$0xff] }
  0x10   :  { %79 = vmatpush.msra.mxu0 %v74_v2  ;;  %v62_v14 = vld [vmem:[#allocation3 + $0x8] sm:$0xff]  ;;  %v61_v15 = vld [vmem:[#allocation3] sm:$0xff]  ;;  %v149_v18 = vld [vmem:[#allocation3 + $0xf8] sm:$0xff] }
  0x11   :  { %v58_v16 = vld [vmem:[%s468_s0] sm:$0xff]  ;;  %v59_v17 = vld [vmem:[%s468_s0 + $0x8] sm:$0xff]  ;;  %v148_v19 = vld [vmem:[#allocation3 + $0xf0] sm:$0xff]  ;;  %150 = vmatpush.msra.mxu2 %v149_v18 }
  0x12   :  { %80 = vmatpush.msra.mxu0 %v73_v3  ;;  %v147_v20 = vld [vmem:[#allocation3 + $0xe8] sm:$0xff]  ;;  %v146_v21 = vld [vmem:[#allocation3 + $0xe0] sm:$0xff]  ;;  %v145_v22 = vld [vmem:[#allocation3 + $0xd8] sm:$0xff] }
  0x13   :  { %151 = vmatpush.msra.mxu2 %v148_v19  ;;  %v144_v23 = vld [vmem:[#allocation3 + $0xd0] sm:$0xff]  ;;  %v143_v24 = vld [vmem:[#allocation3 + $0xc8] sm:$0xff]  ;;  %v142_v26 = vld [vmem:[#allocation3 + $0xc0] sm:$0xff] }
  0x14   :  { %81 = vmatpush.msra.mxu0 %v72_v4  ;;  %v141_v27 = vld [vmem:[#allocation3 + $0xb8] sm:$0xff]  ;;  %v140_v28 = vld [vmem:[#allocation3 + $0xb0] sm:$0xff]  ;;  %v139_v29 = vld [vmem:[#allocation3 + $0xa8] sm:$0xff] }
  0x15   :  { %152 = vmatpush.msra.mxu2 %v147_v20  ;;  %v138_v31 = vld [vmem:[#allocation3 + $0xa0] sm:$0xff]  ;;  %v137_v33 = vld [vmem:[#allocation3 + $0x98] sm:$0xff]  ;;  %v439_v34 = vld [vmem:[%s469_s1 + $0x8] sm:$0xff] }
  0x16   :  { %82 = vmatpush.msra.mxu0 %v71_v5  ;;  %v432_v32 = vld [vmem:[%s469_s1] sm:$0xff]  ;;  %v136_v35 = vld [vmem:[#allocation3 + $0x90] sm:$0xff]  ;;  %v135_v36 = vld [vmem:[#allocation3 + $0x88] sm:$0xff] }
  0x17   :  { %153 = vmatpush.msra.mxu2 %v146_v21  ;;  %v134_v37 = vld [vmem:[#allocation3 + $0x80] sm:$0xff]  ;;  %v215_v46 = vld [vmem:[#allocation3 + $0x178] sm:$0xff]  ;;  %v214_v47 = vld [vmem:[#allocation3 + $0x170] sm:$0xff] }
  0x18   :  { %83 = vmatpush.msra.mxu0 %v70_v6  ;;  %v446_v38 = vld [vmem:[%s471_s3] sm:$0x7]  ;;  %v213_v48 = vld [vmem:[#allocation3 + $0x168] sm:$0xff]  ;;  %v211_v50 = vld [vmem:[#allocation3 + $0x158] sm:$0xff] }
  0x19   :  { %154 = vmatpush.msra.mxu2 %v145_v22  ;;  %v100_v39 = vperm.slane %v446_v38, 0  ;;  %v212_v49 = vld [vmem:[#allocation3 + $0x160] sm:$0xff]  ;;  %v210_v51 = vld [vmem:[#allocation3 + $0x150] sm:$0xff]  ;;  %v209_v52 = vld [vmem:[#allocation3 + $0x148] sm:$0xff]  ;;  %v173_v0 = vperm.slane %v446_v38, 1 }
  0x1a   :  { %84 = vmatpush.msra.mxu0 %v69_v7  ;;  %v208_v53 = vld [vmem:[#allocation3 + $0x140] sm:$0xff]  ;;  %v207_v54 = vld [vmem:[#allocation3 + $0x138] sm:$0xff]  ;;  %v206_v55 = vld [vmem:[#allocation3 + $0x130] sm:$0xff] }
  0x1b   :  { %155 = vmatpush.msra.mxu2 %v144_v23  ;;  %v205_v56 = vld [vmem:[#allocation3 + $0x128] sm:$0xff]  ;;  %v204_v58 = vld [vmem:[#allocation3 + $0x120] sm:$0xff]  ;;  %v203_v59 = vld [vmem:[#allocation3 + $0x118] sm:$0xff] }
  0x1c   :  { %85 = vmatpush.msra.mxu0 %v68_v8  ;;  %v202_v61 = vld [vmem:[#allocation3 + $0x110] sm:$0xff]  ;;  %v201_v62 = vld [vmem:[#allocation3 + $0x108] sm:$0xff]  ;;  %v200_v63 = vld [vmem:[#allocation3 + $0x100] sm:$0xff] }
  0x1d   :  { %156 = vmatpush.msra.mxu2 %v143_v24  ;;  %v271_v18 = vld [vmem:[#allocation5 + $0x30] sm:$0xff]  ;;  %v270_v19 = vld [vmem:[#allocation5 + $0x28] sm:$0xff]  ;;  %v269_v20 = vld [vmem:[#allocation5 + $0x20] sm:$0xff] }
  0x1e   :  { %86 = vmatpush.msra.mxu0 %v67_v9  ;;  %v280_v9 = vld [vmem:[#allocation5 + $0x78] sm:$0xff]  ;;  %v267_v22 = vld [vmem:[#allocation5 + $0x10] sm:$0xff]  ;;  %v266_v23 = vld [vmem:[#allocation5 + $0x8] sm:$0xff] }
  0x1f   :  { %157 = vmatpush.msra.mxu2 %v142_v26  ;;  %v268_v21 = vld [vmem:[#allocation5 + $0x18] sm:$0xff]  ;;  %v265_v24 = vld [vmem:[#allocation5] sm:$0xff] }
  0x20   :  { %87 = vmatpush.msra.mxu0 %v66_v10  ;;  %v279_v10 = vld [vmem:[#allocation5 + $0x70] sm:$0xff] }
  0x21   :  { %158 = vmatpush.msra.mxu2 %v141_v27 }
  0x22   :  { %88 = vmatpush.msra.mxu0 %v65_v11  ;;  %v278_v11 = vld [vmem:[#allocation5 + $0x68] sm:$0xff] }
  0x23   :  { %159 = vmatpush.msra.mxu2 %v140_v28 }
  0x24   :  { %89 = vmatpush.msra.mxu0 %v64_v12  ;;  %v277_v12 = vld [vmem:[#allocation5 + $0x60] sm:$0xff] }
  0x25   :  { %160 = vmatpush.msra.mxu2 %v139_v29 }
  0x26   :  { %90 = vmatpush.msra.mxu0 %v63_v13  ;;  %v276_v13 = vld [vmem:[#allocation5 + $0x58] sm:$0xff] }
  0x27   :  { %161 = vmatpush.msra.mxu2 %v138_v31 }
  0x28   :  { %91 = vmatpush.msra.mxu0 %v62_v14  ;;  %v275_v14 = vld [vmem:[#allocation5 + $0x50] sm:$0xff] }
  0x29   :  { %162 = vmatpush.msra.mxu2 %v137_v33 }
  0x2a   :  { %92 = vmatpush.msra.mxu0 %v61_v15  ;;  %v274_v15 = vld [vmem:[#allocation5 + $0x48] sm:$0xff] }
  0x2b   :  { %93 = vmatmul.f32.vlgmr.msra.gmra.mxu0 %v58_v16  ;;  %163 = vmatpush.msra.mxu2 %v136_v35  ;;  %v273_v16 = vld [vmem:[#allocation5 + $0x40] sm:$0xff] }
  0x2d   :  { %164 = vmatpush.msra.mxu2 %v135_v36 }
  0x2f   :  { %165 = vmatpush.msra.mxu2 %v134_v37 }
  0x33   :  { %96 = vmatmul.f32.gmra.mxu0 %v59_v17  ;;  %v272_v17 = vld [vmem:[#allocation5 + $0x38] sm:$0xff] }
  0xa8   :  { %v94_v25 = vpop.f32.mrf.mxu0 }
  0xb0   :  { %v97_v30 = vpop.f32.mrf.mxu0 }
  0xb1   :  { %122 = vmatpush.msra.mxu1 %v97_v30 }
  0xb3   :  { %123 = vmatpush.msra.mxu1 %v94_v25  ;;  %v239_v25 = vperm.slane %v446_v38, 2 }
  0xb4   :  { %314 = vmatmul.msk.f32.vlgmr.msra.gmra.mxu1 %vm101_vm0, %v432_v32 }
  0xb5   :  { %216 = vmatpush.msrb.mxu1 %v215_v46 }
  0xb7   :  { %217 = vmatpush.msrb.mxu1 %v214_v47 }
  0xb9   :  { %218 = vmatpush.msrb.mxu1 %v213_v48 }
  0xbb   :  { %219 = vmatpush.msrb.mxu1 %v212_v49 }
  0xbc   :  { %315 = vmatmul.msk.f32.gmra.mxu1 %vm101_vm0, %v439_v34 }
  0xbd   :  { %220 = vmatpush.msrb.mxu1 %v211_v50 }
  0xbf   :  { %221 = vmatpush.msrb.mxu1 %v210_v51 }
  0xc1   :  { %222 = vmatpush.msrb.mxu1 %v209_v52 }
  0xc3   :  { %223 = vmatpush.msrb.mxu1 %v208_v53 }
  0xc5   :  { %224 = vmatpush.msrb.mxu1 %v207_v54 }
  0xc7   :  { %225 = vmatpush.msrb.mxu1 %v206_v55 }
  0xc9   :  { %226 = vmatpush.msrb.mxu1 %v205_v56 }
  0xcb   :  { %227 = vmatpush.msrb.mxu1 %v204_v58 }
  0xcd   :  { %228 = vmatpush.msrb.mxu1 %v203_v59 }
  0xcf   :  { %229 = vmatpush.msrb.mxu1 %v202_v61 }
  0xd1   :  { %230 = vmatpush.msrb.mxu1 %v201_v62 }
  0xd3   :  { %231 = vmatpush.msrb.mxu1 %v200_v63 }
 0x131   :  { %v125_v40 = vpop.f32.mrf.mxu1 }
 0x132   :  { %v126_v41 = vadd.f32 %v125_v40, %v100_v39 }
 0x134   :  { %v131_v42 = vmax.f32 %v126_v41, 0.0 }
 0x136   :  { %166 = vmatmul.f32.vlgmr.msra.gmra.mxu2 %v131_v42 }
 0x139   :  { %v128_v43 = vpop.f32.mrf.mxu1 }
 0x13a   :  { %v129_v44 = vadd.f32 %v128_v43, %v100_v39 }
 0x13c   :  { %v132_v45 = vmax.f32 %v129_v44, 0.0 }
 0x13e   :  { %169 = vmatmul.f32.gmra.mxu2 %v132_v45 }
 0x1b9   :  { %v167_v57 = vpop.f32.mrf.mxu2 }
 0x1c1   :  { %v170_v60 = vpop.f32.mrf.mxu2 }
 0x1c2   :  { %188 = vmatpush.msrb.mxu0 %v170_v60  ;;  %320 = vmatpush.msrb.mxu2 %v170_v60 }
 0x1c4   :  { %189 = vmatpush.msrb.mxu0 %v167_v57  ;;  %321 = vmatpush.msrb.mxu2 %v167_v57 }
 0x1c5   :  { %316 = vmatmul.msk.f32.vlgmr.msrb.gmra.mxu0 %vm101_vm0, %v432_v32  ;;  %317 = vmatmul.msk.f32.vlgmr.msrb.gmra.mxu2 %vm101_vm0, %v439_v34 }
 0x242   :  { %v191_v1 = vpop.f32.mrf.mxu0 }
 0x243   :  { %v192_v2 = vadd.f32 %v191_v1, %v173_v0 }
 0x245   :  { %v197_v3 = vmax.f32 %v192_v2, 0.0 }
 0x247   :  { %232 = vmatmul.f32.vlgmr.msrb.gmra.mxu1 %v197_v3 }
 0x248   :  { %v194_v4 = vpop.f32.mrf.mxu2 }
 0x249   :  { %v195_v5 = vadd.f32 %v194_v4, %v173_v0 }
 0x24b   :  { %v198_v6 = vmax.f32 %v195_v5, 0.0 }
 0x24f   :  { %235 = vmatmul.f32.gmra.mxu1 %v198_v6 }
 0x2c4   :  { %v233_v7 = vpop.f32.mrf.mxu1 }
 0x2cc   :  { %v236_v8 = vpop.f32.mrf.mxu1 }
 0x2cd   :  { %254 = vmatpush.msra.mxu3 %v236_v8 }
 0x2cf   :  { %255 = vmatpush.msra.mxu3 %v233_v7 }
 0x2d0   :  { %318 = vmatmul.msk.f32.vlgmr.msra.gmra.mxu3 %vm101_vm0, %v432_v32  ;;  %v282_v32 = vstv %s473_s5 }
 0x2d1   :  { %283 = vmatpush.msrb.mxu3 %v280_v9 }
 0x2d3   :  { %284 = vmatpush.msrb.mxu3 %v279_v10 }
 0x2d5   :  { %285 = vmatpush.msrb.mxu3 %v278_v11 }
 0x2d7   :  { %286 = vmatpush.msrb.mxu3 %v277_v12 }
 0x2d8   :  { %319 = vmatmul.msk.f32.gmra.mxu3 %vm101_vm0, %v439_v34 }
 0x2d9   :  { %287 = vmatpush.msrb.mxu3 %v276_v13 }
 0x2db   :  { %288 = vmatpush.msrb.mxu3 %v275_v14 }
 0x2dd   :  { %289 = vmatpush.msrb.mxu3 %v274_v15 }
 0x2df   :  { %290 = vmatpush.msrb.mxu3 %v273_v16 }
 0x2e1   :  { %291 = vmatpush.msrb.mxu3 %v272_v17 }
 0x2e3   :  { %292 = vmatpush.msrb.mxu3 %v271_v18 }
 0x2e5   :  { %293 = vmatpush.msrb.mxu3 %v270_v19 }
 0x2e7   :  { %294 = vmatpush.msrb.mxu3 %v269_v20 }
 0x2e9   :  { %295 = vmatpush.msrb.mxu3 %v268_v21 }
 0x2eb   :  { %296 = vmatpush.msrb.mxu3 %v267_v22 }
 0x2ed   :  { %297 = vmatpush.msrb.mxu3 %v266_v23 }
 0x2ef   :  { %298 = vmatpush.msrb.mxu3 %v265_v24 }
 0x353   :  { %v257_v26 = vpop.f32.mrf.mxu3 }
 0x354   :  { %v258_v27 = vadd.f32 %v257_v26, %v239_v25 }
 0x356   :  { %v263_v28 = vmax.f32 %v258_v27, 0.0 }
 0x358   :  { %299 = vmatmul.f32.vlgmr.msrb.gmra.mxu3 %v263_v28 }
 0x35b   :  { %v260_v29 = vpop.f32.mrf.mxu3 }
 0x35c   :  { %v261_v30 = vadd.f32 %v260_v29, %v239_v25 }
 0x35e   :  { %v264_v31 = vmax.f32 %v261_v30, 0.0 }
 0x360   :  { %302 = vmatmul.f32.gmra.mxu3 %v264_v31 }
 0x3db   :  { %v300_v33 = vpop.f32.mrf.mxu3 }
 0x3dc   :  { %v301_v34 = vadd.f32 %v300_v33, %v282_v32 }
 0x3de   :  { %306 = vst [vmem:[%s474_s6] sm:$0xff] %v301_v34 }
 0x3e3   :  { %v303_v35 = vpop.f32.mrf.mxu3 }
 0x3e4   :  { %v304_v36 = vadd.f32 %v303_v35, %v282_v32 }
 0x3e6   :  { %307 = vst [vmem:[%s474_s6 + $0x8] sm:$0xff] %v304_v36 }
 0x3e7   :  { %312 = vsyncpa [#allocation4], 1 }
 0x3e8   :  { %313 = vsyncpa [#allocation6], 1 }

</bundles_post_ra>
